<compile_context>
chip_gen: v7x
topology: tpu7x:2x2x1
jax: 0.10.0
libtpu: 0.0.40
codegen_flags: <defaults>
</compile_context>

<pallas_src>
import jax
import jax.numpy as jnp
from jax.experimental import pallas as pl
from jax.experimental.pallas import tpu as pltpu


def _round_up(x, m):
    return (x + m - 1) // m * m


def _cdiv(a, b):
    return -(-a // b)


def dnn_kernel(state_ref,
               w1_ref, b1_ref,
               w2_ref, b2_ref,
               wh1_ref, bh1_ref,
               wh2_ref, bh2_ref,
               out_ref):
    """One batch tile of the dueling forward pass (4 MXU matmuls total)."""
    wdt = w1_ref.dtype
    relu = lambda z: jnp.maximum(z, 0.0)

    def mm(a, w_ref):
        # weight-dtype x weight-dtype on the MXU, f32 accumulation.
        return jnp.dot(a.astype(wdt), w_ref[...],
                       preferred_element_type=jnp.float32)

    x = state_ref[...]                                            # (tb, S)

    h = relu(mm(x, w1_ref) + b1_ref[...])                         # (tb, 512) f32
    h = relu(mm(h, w2_ref) + b2_ref[...])                         # (tb, 256) f32

    # Fused head layer 1: [adv1 | val1] in a single (256, 320) matmul.
    head = relu(mm(h, wh1_ref) + bh1_ref[...])                    # (tb, 320) f32

    # Fused head layer 2: block-diagonal [[adv2, 0], [0, val2]] -> (tb, A+1),
    # columns [:A] = relu(adv2), column A = relu(val2).
    out2 = relu(mm(head, wh2_ref) + bh2_ref[...])                 # (tb, A+1) f32
    w = out2.shape[-1]
    A = w - 1

    # Build the merged output with pure elementwise/broadcast ops (no concat,
    # no sub-lane slice stores): cols [:A] = val + adv, col A = adv row-sum.
    col = jax.lax.broadcasted_iota(jnp.int32, out2.shape, 1)
    adv_mask = (col < A).astype(jnp.float32)
    adv_full = out2 * adv_mask                                    # adv, col A zeroed
    val = jnp.sum(out2 * (1.0 - adv_mask), axis=-1, keepdims=True)   # (tb, 1)
    adv_rowsum = jnp.sum(adv_full, axis=-1, keepdims=True)            # (tb, 1)
    out_ref[...] = jnp.where(col < A, adv_full + val, adv_rowsum)


def dnn_forward(state, params, *, tile_b=256):
    """qvals = val + (adv - adv.mean())  — matches DNN.forward."""
    B, S = state.shape
    A = params["wh2"].shape[1] - 1

    # Cast the only batch-scaled input to the weight dtype in the wrapper
    # (bf16 by default -> half the HBM DMA; identical math since the kernel
    # rounds matmul inputs to the weight dtype anyway).
    x = state.astype(params["w1"].dtype)

    # Batch tiling: sublane-aligned tile; if more than one tile is needed, keep
    # the tile count even so v7x's two TensorCores split the parallel axis evenly.
    tb = min(tile_b, _round_up(B, 8))
    n_tiles = _cdiv(B, tb)
    if n_tiles > 1 and n_tiles % 2 == 1:
        n_tiles += 1
        tb = _round_up(_cdiv(B, n_tiles), 8)
    b_pad = tb * n_tiles
    if b_pad != B:
        x = jnp.pad(x, ((0, b_pad - B), (0, 0)))
    grid = (n_tiles,)

    args = (x,
            params["w1"], params["b1"],
            params["w2"], params["b2"],
            params["wh1"], params["bh1"],
            params["wh2"], params["bh2"])

    def full_spec(arr):
        # Whole (tiny) parameter resident in VMEM; same block every grid step.
        nd = arr.ndim
        return pl.BlockSpec(arr.shape, lambda i: (0,) * nd)

    in_specs = [pl.BlockSpec((tb, S), lambda i: (i, 0))] + \
               [full_spec(a) for a in args[1:]]
    out_specs = pl.BlockSpec((tb, A + 1), lambda i: (i, 0))
    out_shape = jax.ShapeDtypeStruct((b_pad, A + 1), jnp.float32)

    h1 = params["w1"].shape[1]
    h2 = params["w2"].shape[1]
    h3 = params["wh1"].shape[1]
    flops = 2 * b_pad * (S * h1 + h1 * h2 + h2 * h3 + h3 * (A + 1))
    bytes_accessed = (sum(a.size * a.dtype.itemsize for a in args[1:])
                      + x.size * x.dtype.itemsize
                      + b_pad * (A + 1) * 4)

    cp_kwargs = dict(dimension_semantics=("parallel",))
    if tb >= 1024:
        # v5e's default scoped-VMEM limit (16 MiB) can trip on very large tiles.
        cp_kwargs["vmem_limit_bytes"] = 64 * 1024 * 1024

    out = pl.pallas_call(
        dnn_kernel,
        out_shape=out_shape,
        grid_spec=pltpu.PrefetchScalarGridSpec(
            num_scalar_prefetch=0,
            grid=grid,
            in_specs=in_specs,
            out_specs=out_specs),
        compiler_params=pltpu.CompilerParams(**cp_kwargs),
        cost_estimate=pl.CostEstimate(
            flops=flops, transcendentals=0, bytes_accessed=bytes_accessed),
    )(*args)

    # Drop batch padding, finish the dueling combine with the GLOBAL mean
    # (torch uses adv.mean() with no dim -> mean over batch AND actions).
    out = out[:B]
    pre = out[:, :A]                  # val + adv
    adv_rowsum = out[:, A:]           # per-row adv sums
    adv_mean = jnp.sum(adv_rowsum) / (B * A)
    return pre - adv_mean


def init_params(key, state_dim, action_dim):
    """Synthetic init: uniform(-0.1, 0.1), matching the end state of
    DNN._init_weights. Weights stored as (in, out) = torch_weight.T."""
    shapes = {
        "w1": (state_dim, 512), "b1": (1, 512),
        "w2": (512, 256),       "b2": (1, 256),
        "wa1": (256, 256),      "ba1": (1, 256),
        "wa2": (256, action_dim), "ba2": (1, action_dim),
        "wv1": (256, 64),       "bv1": (1, 64),
        "wv2": (64, 1),         "bv2": (1, 1),
    }
    keys = jax.random.split(key, len(shapes))
    return {name: jax.random.uniform(k, shp, dtype=jnp.float32,
                                     minval=-0.1, maxval=0.1)
            for k, (name, shp) in zip(keys, shapes.items())}


def prepare_params(raw, weight_dtype=jnp.bfloat16):
    """Fuse the head weights and cast matmul weights to the chosen dtype.

    - wh1 = [adv1 | val1]                   : (256, 320)
    - wh2 = [[adv2, 0], [0, val2]]          : (320, A+1) block-diagonal
    Biases stay f32 (all elementwise work stays on the f32 VPU path).
    Pass weight_dtype=jnp.float32 for bit-parity with the torch f32 module."""
    wd = weight_dtype
    A = raw["wa2"].shape[1]
    wh1 = jnp.concatenate([raw["wa1"], raw["wv1"]], axis=1)          # (256, 320)
    bh1 = jnp.concatenate([raw["ba1"], raw["bv1"]], axis=1)          # (1, 320)
    wh2 = jnp.zeros((wh1.shape[1], A + 1), dtype=jnp.float32)
    wh2 = wh2.at[:256, :A].set(raw["wa2"])
    wh2 = wh2.at[256:, A:].set(raw["wv2"])
    bh2 = jnp.concatenate([raw["ba2"], raw["bv2"]], axis=1)          # (1, A+1)
    return {
        "w1": raw["w1"].astype(wd), "b1": raw["b1"],
        "w2": raw["w2"].astype(wd), "b2": raw["b2"],
        "wh1": wh1.astype(wd), "bh1": bh1,
        "wh2": wh2.astype(wd), "bh2": bh2,
    }


def dnn_reference(state, raw, weight_dtype=jnp.bfloat16):
    """Pure-JAX reference with the ORIGINAL (unfused) layer structure. Matmul
    inputs are rounded to the dtype the kernel consumes, so this verifies the
    structural changes (fusion, tiling, merged output, wrapper mean) rather
    than dtype rounding noise."""
    wd = weight_dtype
    r = lambda z: jnp.maximum(z, 0.0)
    dot = lambda a, w: jnp.dot(a.astype(wd), w.astype(wd),
                               preferred_element_type=jnp.float32)
    h = r(dot(state, raw["w1"]) + raw["b1"])
    h = r(dot(h, raw["w2"]) + raw["b2"])
    adv = r(dot(h, raw["wa1"]) + raw["ba1"])
    val = r(dot(h, raw["wv1"]) + raw["bv1"])
    adv = r(dot(adv, raw["wa2"]) + raw["ba2"])
    val = r(dot(val, raw["wv2"]) + raw["bv2"])
    return val + (adv - jnp.mean(adv))


if __name__ == "__main__":
    state_dim = 32
    action_dim = 8
    batch = 2

    key = jax.random.PRNGKey(0)
    k_state, k_params, k_big = jax.random.split(key, 3)

    raw = init_params(k_params, state_dim, action_dim)
    params = prepare_params(raw, weight_dtype=jnp.bfloat16)

    # Small-batch path (single grid step, batch padded to 8 sublanes).
    state = jax.random.normal(k_state, (batch, state_dim), dtype=jnp.float32)
    qvals = jax.block_until_ready(dnn_forward(state, params))
    ref = dnn_reference(state, raw)
    assert qvals.shape == (batch, action_dim)
    assert jnp.allclose(qvals, ref, atol=1e-3, rtol=1e-3), "small-batch mismatch"

    # Batch-tiled path: default 256-row tiles -> grid=(2,), even for v7x megacore.
    big_state = jax.random.normal(k_big, (300, state_dim), dtype=jnp.float32)
    q_big = jax.block_until_ready(dnn_forward(big_state, params))
    ref_big = dnn_reference(big_state, raw)
    assert q_big.shape == (300, action_dim)
    assert jnp.allclose(q_big, ref_big, atol=1e-3, rtol=1e-3), "big-batch mismatch"

    # Odd tile count gets bumped to an even count (tile_b=128: 3 tiles -> 4 x 80 rows).
    q_odd = jax.block_until_ready(dnn_forward(big_state, params, tile_b=128))
    assert jnp.allclose(q_odd, ref_big, atol=1e-3, rtol=1e-3), "odd-tile mismatch"

    print("KERNEL_OK")
</pallas_src>

<mosaic_0001>
module attributes {stable_mosaic.version = 11 : i64} {
  func.func @dnn_kernel(%arg0: i32, %arg1: memref<8x32xbf16, #tpu.memory_space<vmem>>, %arg2: memref<32x512xbf16, #tpu.memory_space<vmem>>, %arg3: memref<1x512xf32, #tpu.memory_space<vmem>>, %arg4: memref<512x256xbf16, #tpu.memory_space<vmem>>, %arg5: memref<1x256xf32, #tpu.memory_space<vmem>>, %arg6: memref<256x320xbf16, #tpu.memory_space<vmem>>, %arg7: memref<1x320xf32, #tpu.memory_space<vmem>>, %arg8: memref<320x9xbf16, #tpu.memory_space<vmem>>, %arg9: memref<1x9xf32, #tpu.memory_space<vmem>>, %arg10: memref<8x9xf32, #tpu.memory_space<vmem>>) attributes {dimension_semantics = [#tpu.dimension_semantics<parallel>], iteration_bounds = array<i64: 1>, scalar_prefetch = 0 : i64, scratch_operands = 0 : i64, tpu.core_type = #tpu.core_type<tc>, window_params = [{transform_indices = @transform_0, window_bounds = array<i64: 8, 32>}, {pipeline_mode = #tpu.pipeline_mode<synchronous>, transform_indices = @transform_1, window_bounds = array<i64: 32, 512>}, {pipeline_mode = #tpu.pipeline_mode<synchronous>, transform_indices = @transform_2, window_bounds = array<i64: 1, 512>}, {pipeline_mode = #tpu.pipeline_mode<synchronous>, transform_indices = @transform_3, window_bounds = array<i64: 512, 256>}, {pipeline_mode = #tpu.pipeline_mode<synchronous>, transform_indices = @transform_4, window_bounds = array<i64: 1, 256>}, {pipeline_mode = #tpu.pipeline_mode<synchronous>, transform_indices = @transform_5, window_bounds = array<i64: 256, 320>}, {pipeline_mode = #tpu.pipeline_mode<synchronous>, transform_indices = @transform_6, window_bounds = array<i64: 1, 320>}, {pipeline_mode = #tpu.pipeline_mode<synchronous>, transform_indices = @transform_7, window_bounds = array<i64: 320, 9>}, {pipeline_mode = #tpu.pipeline_mode<synchronous>, transform_indices = @transform_8, window_bounds = array<i64: 1, 9>}, {transform_indices = @transform_9, window_bounds = array<i64: 8, 9>}]} {
    %c0 = arith.constant 0 : index
    %c0_0 = arith.constant 0 : index
    %0 = vector.load %arg1[%c0, %c0_0] : memref<8x32xbf16, #tpu.memory_space<vmem>>, vector<8x32xbf16>
    %c0_1 = arith.constant 0 : index
    %c0_2 = arith.constant 0 : index
    %1 = vector.load %arg2[%c0_1, %c0_2] : memref<32x512xbf16, #tpu.memory_space<vmem>>, vector<32x512xbf16>
    %cst = arith.constant dense<0.000000e+00> : vector<8x512xf32>
    %2 = tpu.matmul %0, %1, %cst {dimension_numbers = #tpu.dot_dimension_numbers<[1], [0], [0], [1], [0, 0, 1, 1], [], []>} : vector<8x32xbf16>, vector<32x512xbf16>, vector<8x512xf32> -> vector<8x512xf32>
    %c0_3 = arith.constant 0 : index
    %c0_4 = arith.constant 0 : index
    %3 = vector.load %arg3[%c0_3, %c0_4] : memref<1x512xf32, #tpu.memory_space<vmem>>, vector<1x512xf32>
    %4 = vector.broadcast %3 : vector<1x512xf32> to vector<8x512xf32>
    %5 = arith.addf %2, %4 : vector<8x512xf32>
    %cst_5 = arith.constant 0.000000e+00 : f32
    %6 = vector.broadcast %cst_5 : f32 to vector<8x512xf32>
    %7 = arith.maximumf %5, %6 : vector<8x512xf32>
    %8 = arith.truncf %7 : vector<8x512xf32> to vector<8x512xbf16>
    %c0_6 = arith.constant 0 : index
    %c0_7 = arith.constant 0 : index
    %9 = vector.load %arg4[%c0_6, %c0_7] : memref<512x256xbf16, #tpu.memory_space<vmem>>, vector<512x256xbf16>
    %cst_8 = arith.constant dense<0.000000e+00> : vector<8x256xf32>
    %10 = tpu.matmul %8, %9, %cst_8 {dimension_numbers = #tpu.dot_dimension_numbers<[1], [0], [0], [1], [0, 0, 1, 1], [], []>} : vector<8x512xbf16>, vector<512x256xbf16>, vector<8x256xf32> -> vector<8x256xf32>
    %c0_9 = arith.constant 0 : index
    %c0_10 = arith.constant 0 : index
    %11 = vector.load %arg5[%c0_9, %c0_10] : memref<1x256xf32, #tpu.memory_space<vmem>>, vector<1x256xf32>
    %12 = vector.broadcast %11 : vector<1x256xf32> to vector<8x256xf32>
    %13 = arith.addf %10, %12 : vector<8x256xf32>
    %cst_11 = arith.constant 0.000000e+00 : f32
    %14 = vector.broadcast %cst_11 : f32 to vector<8x256xf32>
    %15 = arith.maximumf %13, %14 : vector<8x256xf32>
    %16 = arith.truncf %15 : vector<8x256xf32> to vector<8x256xbf16>
    %c0_12 = arith.constant 0 : index
    %c0_13 = arith.constant 0 : index
    %17 = vector.load %arg6[%c0_12, %c0_13] : memref<256x320xbf16, #tpu.memory_space<vmem>>, vector<256x320xbf16>
    %cst_14 = arith.constant dense<0.000000e+00> : vector<8x320xf32>
    %18 = tpu.matmul %16, %17, %cst_14 {dimension_numbers = #tpu.dot_dimension_numbers<[1], [0], [0], [1], [0, 0, 1, 1], [], []>} : vector<8x256xbf16>, vector<256x320xbf16>, vector<8x320xf32> -> vector<8x320xf32>
    %c0_15 = arith.constant 0 : index
    %c0_16 = arith.constant 0 : index
    %19 = vector.load %arg7[%c0_15, %c0_16] : memref<1x320xf32, #tpu.memory_space<vmem>>, vector<1x320xf32>
    %20 = vector.broadcast %19 : vector<1x320xf32> to vector<8x320xf32>
    %21 = arith.addf %18, %20 : vector<8x320xf32>
    %cst_17 = arith.constant 0.000000e+00 : f32
    %22 = vector.broadcast %cst_17 : f32 to vector<8x320xf32>
    %23 = arith.maximumf %21, %22 : vector<8x320xf32>
    %24 = arith.truncf %23 : vector<8x320xf32> to vector<8x320xbf16>
    %c0_18 = arith.constant 0 : index
    %c0_19 = arith.constant 0 : index
    %25 = vector.load %arg8[%c0_18, %c0_19] : memref<320x9xbf16, #tpu.memory_space<vmem>>, vector<320x9xbf16>
    %cst_20 = arith.constant dense<0.000000e+00> : vector<8x9xf32>
    %26 = tpu.matmul %24, %25, %cst_20 {dimension_numbers = #tpu.dot_dimension_numbers<[1], [0], [0], [1], [0, 0, 1, 1], [], []>} : vector<8x320xbf16>, vector<320x9xbf16>, vector<8x9xf32> -> vector<8x9xf32>
    %c0_21 = arith.constant 0 : index
    %c0_22 = arith.constant 0 : index
    %27 = vector.load %arg9[%c0_21, %c0_22] : memref<1x9xf32, #tpu.memory_space<vmem>>, vector<1x9xf32>
    %28 = vector.broadcast %27 : vector<1x9xf32> to vector<8x9xf32>
    %29 = arith.addf %26, %28 : vector<8x9xf32>
    %cst_23 = arith.constant 0.000000e+00 : f32
    %30 = vector.broadcast %cst_23 : f32 to vector<8x9xf32>
    %31 = arith.maximumf %29, %30 : vector<8x9xf32>
    %32 = tpu.iota {dimensions = array<i32: 1>} : vector<8x9xi32>
    %c8_i32 = arith.constant 8 : i32
    %33 = vector.broadcast %c8_i32 : i32 to vector<8x9xi32>
    %34 = arith.cmpi slt, %32, %33 : vector<8x9xi32>
    %35 = arith.extui %34 : vector<8x9xi1> to vector<8x9xi32>
    %36 = arith.sitofp %35 : vector<8x9xi32> to vector<8x9xf32>
    %37 = arith.mulf %31, %36 : vector<8x9xf32>
    %cst_24 = arith.constant 1.000000e+00 : f32
    %38 = vector.broadcast %cst_24 : f32 to vector<8x9xf32>
    %39 = arith.subf %38, %36 : vector<8x9xf32>
    %40 = arith.mulf %31, %39 : vector<8x9xf32>
    %cst_25 = arith.constant dense<0.000000e+00> : vector<8xf32>
    %41 = vector.multi_reduction <add>, %40, %cst_25 [1] : vector<8x9xf32> to vector<8xf32>
    %42 = vector.shape_cast %41 : vector<8xf32> to vector<8x1xf32>
    %cst_26 = arith.constant dense<0.000000e+00> : vector<8xf32>
    %43 = vector.multi_reduction <add>, %37, %cst_26 [1] : vector<8x9xf32> to vector<8xf32>
    %44 = vector.shape_cast %43 : vector<8xf32> to vector<8x1xf32>
    %c8_i32_27 = arith.constant 8 : i32
    %45 = vector.broadcast %c8_i32_27 : i32 to vector<8x9xi32>
    %46 = arith.cmpi slt, %32, %45 : vector<8x9xi32>
    %47 = vector.broadcast %42 : vector<8x1xf32> to vector<8x9xf32>
    %48 = arith.addf %37, %47 : vector<8x9xf32>
    %49 = vector.shape_cast %44 : vector<8x1xf32> to vector<8x1xf32>
    %50 = vector.broadcast %49 : vector<8x1xf32> to vector<8x9xf32>
    %51 = arith.select %46, %48, %50 : vector<8x9xi1>, vector<8x9xf32>
    %c0_28 = arith.constant 0 : index
    %c0_29 = arith.constant 0 : index
    %52 = vector.load %arg10[%c0_28, %c0_29] : memref<8x9xf32, #tpu.memory_space<vmem>>, vector<8x9xf32>
    tpu.vector_store %arg10[%c0_28, %c0_29], %51 {strides = array<i32>} : memref<8x9xf32, #tpu.memory_space<vmem>>, vector<8x9xf32>,
    return
  }
  func.func @transform_0(%arg0: i32) -> (i32, i32) {
    %c0_i32 = arith.constant 0 : i32
    %c0_i32_0 = arith.constant 0 : i32
    return %arg0, %c0_i32 : i32, i32
  }
  func.func @transform_1(%arg0: i32) -> (i32, i32) {
    %c0_i32 = arith.constant 0 : i32
    %c0_i32_0 = arith.constant 0 : i32
    %c0_i32_1 = arith.constant 0 : i32
    return %c0_i32, %c0_i32_0 : i32, i32
  }
  func.func @transform_2(%arg0: i32) -> (i32, i32) {
    %c0_i32 = arith.constant 0 : i32
    %c0_i32_0 = arith.constant 0 : i32
    %c0_i32_1 = arith.constant 0 : i32
    return %c0_i32, %c0_i32_0 : i32, i32
  }
  func.func @transform_3(%arg0: i32) -> (i32, i32) {
    %c0_i32 = arith.constant 0 : i32
    %c0_i32_0 = arith.constant 0 : i32
    %c0_i32_1 = arith.constant 0 : i32
    return %c0_i32, %c0_i32_0 : i32, i32
  }
  func.func @transform_4(%arg0: i32) -> (i32, i32) {
    %c0_i32 = arith.constant 0 : i32
    %c0_i32_0 = arith.constant 0 : i32
    %c0_i32_1 = arith.constant 0 : i32
    return %c0_i32, %c0_i32_0 : i32, i32
  }
  func.func @transform_5(%arg0: i32) -> (i32, i32) {
    %c0_i32 = arith.constant 0 : i32
    %c0_i32_0 = arith.constant 0 : i32
    %c0_i32_1 = arith.constant 0 : i32
    return %c0_i32, %c0_i32_0 : i32, i32
  }
  func.func @transform_6(%arg0: i32) -> (i32, i32) {
    %c0_i32 = arith.constant 0 : i32
    %c0_i32_0 = arith.constant 0 : i32
    %c0_i32_1 = arith.constant 0 : i32
    return %c0_i32, %c0_i32_0 : i32, i32
  }
  func.func @transform_7(%arg0: i32) -> (i32, i32) {
    %c0_i32 = arith.constant 0 : i32
    %c0_i32_0 = arith.constant 0 : i32
    %c0_i32_1 = arith.constant 0 : i32
    return %c0_i32, %c0_i32_0 : i32, i32
  }
  func.func @transform_8(%arg0: i32) -> (i32, i32) {
    %c0_i32 = arith.constant 0 : i32
    %c0_i32_0 = arith.constant 0 : i32
    %c0_i32_1 = arith.constant 0 : i32
    return %c0_i32, %c0_i32_0 : i32, i32
  }
  func.func @transform_9(%arg0: i32) -> (i32, i32) {
    %c0_i32 = arith.constant 0 : i32
    %c0_i32_0 = arith.constant 0 : i32
    return %arg0, %c0_i32 : i32, i32
  }
}

</mosaic_0001>

<bundles_post_ra>
// kernel: tpu_custom_call.1
= control target key start
LH: loop header
LB: loop body
LE: loop exit
PB: predicated region body
PF: predicated region fallthrough
CT: control target
= control target key end

     0   :  { %v1821_v2 = vmov 0   ;;  %vm105_vm0 = vcmask 261120   ;;  %s2357_s0 = inlined_call_operand.vmem [shape: bf16[8,32], index: 0, kind: input, shape index: {}]   ;;  %s2358_s1 = inlined_call_operand.vmem [shape: bf16[32,512], index: 1, kind: input, shape index: {}]   ;;  %s2359_s2 = inlined_call_operand.vmem [shape: f32[1,512], index: 2, kind: input, shape index: {}]   ;;  %s2360_s3 = inlined_call_operand.vmem [shape: bf16[512,256], index: 3, kind: input, shape index: {}]   ;;  %s2361_s4 = inlined_call_operand.vmem [shape: f32[1,256], index: 4, kind: input, shape index: {}]   ;;  %s2362_s5 = inlined_call_operand.vmem [shape: bf16[256,320], index: 5, kind: input, shape index: {}]   ;;  %s2363_s6 = inlined_call_operand.vmem [shape: f32[1,320], index: 6, kind: input, shape index: {}]   ;;  %s2364_s7 = inlined_call_operand.vmem [shape: bf16[320,9], index: 7, kind: input, shape index: {}]   ;;  %s2365_s8 = inlined_call_operand.vmem [shape: f32[1,9], index: 8, kind: input, shape index: {}]   ;;  %s2366_s9 = inlined_call_operand.hbm [shape: f32[8,9], index: 9, kind: output, shape index: {}]  }
   0x1   :  { %v1605_v0 = vld [vmem:[%s2358_s1 + $0x4] ss:$16 sps:$4 sm:$0xff]   ;;  %v1607_v1 = vld [vmem:[%s2358_s1] ss:$16 sps:$4 sm:$0xff]   ;;  %141 = vmatprep.mubr.bf16.mxu1 %v1821_v2  ;;  %v1613_v5 = vld [vmem:[%s2358_s1 + $0xc] ss:$16 sps:$4 sm:$0xff]  }
   0x2   :  { %109 = vmatprep.subr.bf16.mxu1 %v1605_v0  ;;  %v1608_v3 = vld [vmem:[%s2358_s1 + $0x24] ss:$16 sps:$4 sm:$0xff]   ;;  %v1610_v4 = vld [vmem:[%s2358_s1 + $0x20] ss:$16 sps:$4 sm:$0xff]   ;;  %v1611_v7 = vld [vmem:[%s2358_s1 + $0x8] ss:$16 sps:$4 sm:$0xff]  }
   0x3   :  { %110 = vmatpush1.bf16.msra.mxu1 %v1607_v1  ;;  %v34_v6 = vld [vmem:[%s2357_s0] sm:$0xf]  ;;  %v1617_v8 = vld [vmem:[%s2360_s3 + $0x4] ss:$8 sps:$4 sm:$0xff]   ;;  %v1620_v10 = vld [vmem:[%s2360_s3 + $0x14] ss:$8 sps:$4 sm:$0xff]  }
   0x4   :  { %111 = vmatprep.subr.bf16.mxu1 %v1608_v3  ;;  %v1619_v9 = vld [vmem:[%s2360_s3] ss:$8 sps:$4 sm:$0xff]   ;;  %v1616_v11 = vld [vmem:[%s2358_s1 + $0x2c] ss:$16 sps:$4 sm:$0xff]   ;;  %595 = vmatprep.subr.bf16.mxu0 %v1617_v8  ;;  %v1622_v12 = vld [vmem:[%s2360_s3 + $0x10] ss:$8 sps:$4 sm:$0xff]  }
   0x5   :  { %596 = vmatpush1.bf16.msra.mxu0 %v1619_v9  ;;  %v1623_v13 = vld [vmem:[%s2360_s3 + $0x24] ss:$8 sps:$4 sm:$0xff]   ;;  %v1614_v14 = vld [vmem:[%s2358_s1 + $0x28] ss:$16 sps:$4 sm:$0xff]   ;;  %v1626_v16 = vld [vmem:[%s2360_s3 + $0x34] ss:$8 sps:$4 sm:$0xff]  }
   0x6   :  { %597 = vmatprep.subr.bf16.mxu0 %v1620_v10  ;;  %v1625_v15 = vld [vmem:[%s2360_s3 + $0x20] ss:$8 sps:$4 sm:$0xff]   ;;  %v1628_v17 = vld [vmem:[%s2360_s3 + $0x30] ss:$8 sps:$4 sm:$0xff]   ;;  %v1629_v18 = vld [vmem:[%s2360_s3 + $0x44] ss:$8 sps:$4 sm:$0xff]  }
   0x7   :  { %112 = vmatpush1.bf16.msra.mxu1 %v1610_v4  ;;  %v1631_v19 = vld [vmem:[%s2360_s3 + $0x40] ss:$8 sps:$4 sm:$0xff]   ;;  %v1632_v20 = vld [vmem:[%s2360_s3 + $0x54] ss:$8 sps:$4 sm:$0xff]   ;;  %v1634_v21 = vld [vmem:[%s2360_s3 + $0x50] ss:$8 sps:$4 sm:$0xff]  }
   0x8   :  { %150 = vmatprep.subr.bf16.mxu1 %v1613_v5  ;;  %v1635_v22 = vld [vmem:[%s2360_s3 + $0x64] ss:$8 sps:$4 sm:$0xff]   ;;  %v1637_v23 = vld [vmem:[%s2360_s3 + $0x60] ss:$8 sps:$4 sm:$0xff]   ;;  %v1638_v24 = vld [vmem:[%s2360_s3 + $0x74] ss:$8 sps:$4 sm:$0xff]  }
   0x9   :  { %598 = vmatpush1.bf16.msra.mxu0 %v1622_v12  ;;  %v1640_v25 = vld [vmem:[%s2360_s3 + $0x70] ss:$8 sps:$4 sm:$0xff]   ;;  %v1641_v26 = vld [vmem:[%s2360_s3 + $0x84] ss:$8 sps:$4 sm:$0xff]   ;;  %v1643_v27 = vld [vmem:[%s2360_s3 + $0x80] ss:$8 sps:$4 sm:$0xff]  }
   0xa   :  { %1397 = vmatmul.mubr.msk.bf16.vlgmr.msra.gmra.mrb[0].mxu1 %vm105_vm0, %v34_v6  ;;  %599 = vmatprep.subr.bf16.mxu0 %v1623_v13  ;;  %v1644_v28 = vld [vmem:[%s2360_s3 + $0x94] ss:$8 sps:$4 sm:$0xff]   ;;  %v1646_v29 = vld [vmem:[%s2360_s3 + $0x90] ss:$8 sps:$4 sm:$0xff]   ;;  %v1647_v30 = vld [vmem:[%s2360_s3 + $0xa4] ss:$8 sps:$4 sm:$0xff]  }
   0xb   :  { %151 = vmatpush1.bf16.msra.mxu1 %v1611_v7  ;;  %182 = vmatprep.mubr.bf16.mxu1 %v1821_v2  ;;  %v1649_v31 = vld [vmem:[%s2360_s3 + $0xa0] ss:$8 sps:$4 sm:$0xff]   ;;  %v1650_v32 = vld [vmem:[%s2360_s3 + $0xb4] ss:$8 sps:$4 sm:$0xff]   ;;  %v1652_v33 = vld [vmem:[%s2360_s3 + $0xb0] ss:$8 sps:$4 sm:$0xff]  }
   0xc   :  { %152 = vmatprep.subr.bf16.mxu1 %v1616_v11  ;;  %v1653_v34 = vld [vmem:[%s2360_s3 + $0xc4] ss:$8 sps:$4 sm:$0xff]   ;;  %v1655_v35 = vld [vmem:[%s2360_s3 + $0xc0] ss:$8 sps:$4 sm:$0xff]   ;;  %v1656_v36 = vld [vmem:[%s2360_s3 + $0xd4] ss:$8 sps:$4 sm:$0xff]  }
   0xd   :  { %600 = vmatpush1.bf16.msra.mxu0 %v1625_v15  ;;  %v1658_v37 = vld [vmem:[%s2360_s3 + $0xd0] ss:$8 sps:$4 sm:$0xff]  }
   0xe   :  { %601 = vmatprep.subr.bf16.mxu0 %v1626_v16 }
   0xf   :  { %153 = vmatpush1.bf16.msra.mxu1 %v1614_v14 }
  0x11   :  { %602 = vmatpush1.bf16.msra.mxu0 %v1628_v17 }
  0x12   :  { %1398 = vmatmul.mubr.msk.bf16.vlgmr.msra.gmra.mrb[4].mxu1 %vm105_vm0, %v34_v6  ;;  %603 = vmatprep.subr.bf16.mxu0 %v1629_v18 }
  0x15   :  { %604 = vmatpush1.bf16.msra.mxu0 %v1631_v19 }
  0x16   :  { %605 = vmatprep.subr.bf16.mxu0 %v1632_v20 }
  0x19   :  { %606 = vmatpush1.bf16.msra.mxu0 %v1634_v21 }
  0x1a   :  { %607 = vmatprep.subr.bf16.mxu0 %v1635_v22 }
  0x1d   :  { %608 = vmatpush1.bf16.msra.mxu0 %v1637_v23 }
  0x1e   :  { %609 = vmatprep.subr.bf16.mxu0 %v1638_v24 }
  0x21   :  { %610 = vmatpush1.bf16.msra.mxu0 %v1640_v25 }
  0x22   :  { %611 = vmatprep.subr.bf16.mxu0 %v1641_v26 }
  0x25   :  { %612 = vmatpush1.bf16.msra.mxu0 %v1643_v27 }
  0x26   :  { %613 = vmatprep.subr.bf16.mxu0 %v1644_v28 }
  0x29   :  { %614 = vmatpush1.bf16.msra.mxu0 %v1646_v29 }
  0x2a   :  { %615 = vmatprep.subr.bf16.mxu0 %v1647_v30 }
  0x2d   :  { %616 = vmatpush1.bf16.msra.mxu0 %v1649_v31 }
  0x2e   :  { %617 = vmatprep.subr.bf16.mxu0 %v1650_v32 }
  0x31   :  { %618 = vmatpush1.bf16.msra.mxu0 %v1652_v33 }
  0x32   :  { %619 = vmatprep.subr.bf16.mxu0 %v1653_v34 }
  0x35   :  { %620 = vmatpush1.bf16.msra.mxu0 %v1655_v35 }
  0x36   :  { %621 = vmatprep.subr.bf16.mxu0 %v1656_v36 }
  0x39   :  { %622 = vmatpush1.bf16.msra.mxu0 %v1658_v37 }
  0x3a   :  { %14 = vsyncpa [#allocation3], 0  ;;  %v1659_v38 = vld [vmem:[%s2360_s3 + $0xe4] ss:$8 sps:$4 sm:$0xff]   ;;  %v1661_v39 = vld [vmem:[%s2360_s3 + $0xe0] ss:$8 sps:$4 sm:$0xff]   ;;  %v45_v1 = vlaneseq }
  0x3b   :  { %623 = vmatprep.subr.bf16.mxu0 %v1659_v38  ;;  %v1662_v40 = vld [vmem:[%s2360_s3 + $0xf4] ss:$8 sps:$4 sm:$0xff]   ;;  %v1664_v41 = vld [vmem:[%s2360_s3 + $0xf0] ss:$8 sps:$4 sm:$0xff]   ;;  %v1667_v42 = vld [vmem:[%s2360_s3 + $0x104] ss:$8 sps:$4 sm:$0xff]  }
  0x3c   :  { %v1713_v43 = vld [vmem:[%s2362_s5] ss:$12 sps:$4 sm:$0xff]   ;;  %v1715_v44 = vld [vmem:[%s2362_s5 + $0x4] ss:$12 sps:$4 sm:$0xff]   ;;  %v1718_v45 = vld [vmem:[%s2362_s5 + $0x1c] ss:$12 sps:$4 sm:$0xff]  }
  0x3d   :  { %624 = vmatpush1.bf16.msra.mxu0 %v1661_v39  ;;  %1018 = vmatprep.subr.bf16.mxu1 %v1715_v44  ;;  %v1716_v46 = vld [vmem:[%s2362_s5 + $0x18] ss:$12 sps:$4 sm:$0xff]   ;;  %v1721_v47 = vld [vmem:[%s2362_s5 + $0x34] ss:$12 sps:$4 sm:$0xff]   ;;  %v1719_v48 = vld [vmem:[%s2362_s5 + $0x30] ss:$12 sps:$4 sm:$0xff]  }
  0x3e   :  { %625 = vmatprep.subr.bf16.mxu0 %v1662_v40  ;;  %1019 = vmatpush1.bf16.msra.mxu1 %v1713_v43  ;;  %v1724_v49 = vld [vmem:[%s2362_s5 + $0x4c] ss:$12 sps:$4 sm:$0xff]   ;;  %v1722_v50 = vld [vmem:[%s2362_s5 + $0x48] ss:$12 sps:$4 sm:$0xff]   ;;  %v1727_v51 = vld [vmem:[%s2362_s5 + $0x64] ss:$12 sps:$4 sm:$0xff]  }
  0x3f   :  { %1020 = vmatprep.subr.bf16.mxu1 %v1718_v45  ;;  %v1725_v52 = vld [vmem:[%s2362_s5 + $0x60] ss:$12 sps:$4 sm:$0xff]   ;;  %v1730_v53 = vld [vmem:[%s2362_s5 + $0x7c] ss:$12 sps:$4 sm:$0xff]   ;;  %v1728_v54 = vld [vmem:[%s2362_s5 + $0x78] ss:$12 sps:$4 sm:$0xff]  }
  0x40   :  { %v1733_v55 = vld [vmem:[%s2362_s5 + $0x94] ss:$12 sps:$4 sm:$0xff]   ;;  %v1731_v56 = vld [vmem:[%s2362_s5 + $0x90] ss:$12 sps:$4 sm:$0xff]   ;;  %v1736_v57 = vld [vmem:[%s2362_s5 + $0xac] ss:$12 sps:$4 sm:$0xff]  }
  0x41   :  { %626 = vmatpush1.bf16.msra.mxu0 %v1664_v41  ;;  %v1734_v58 = vld [vmem:[%s2362_s5 + $0xa8] ss:$12 sps:$4 sm:$0xff]   ;;  %v1739_v59 = vld [vmem:[%s2362_s5 + $0xc4] ss:$12 sps:$4 sm:$0xff]   ;;  %v1737_v60 = vld [vmem:[%s2362_s5 + $0xc0] ss:$12 sps:$4 sm:$0xff]  }
  0x42   :  { %636 = vmatprep.subr.bf16.mxu0 %v1667_v42  ;;  %1021 = vmatpush1.bf16.msra.mxu1 %v1716_v46  ;;  %v1742_v61 = vld [vmem:[%s2362_s5 + $0xdc] ss:$12 sps:$4 sm:$0xff]   ;;  %v1740_v62 = vld [vmem:[%s2362_s5 + $0xd8] ss:$12 sps:$4 sm:$0xff]   ;;  %v1745_v63 = vld [vmem:[%s2362_s5 + $0xf4] ss:$12 sps:$4 sm:$0xff]  }
  0x43   :  { %1022 = vmatprep.subr.bf16.mxu1 %v1721_v47  ;;  %v1743_v0 = vld [vmem:[%s2362_s5 + $0xf0] ss:$12 sps:$4 sm:$0xff]   ;;  %v1748_v2 = vld [vmem:[%s2362_s5 + $0x10c] ss:$12 sps:$4 sm:$0xff]   ;;  %v1746_v3 = vld [vmem:[%s2362_s5 + $0x108] ss:$12 sps:$4 sm:$0xff]  }
  0x44   :  { %v2076_v4 = vshrl.u32 %v45_v1, 7  ;;  %v1751_v5 = vld [vmem:[%s2362_s5 + $0x124] ss:$12 sps:$4 sm:$0xff]   ;;  %v1749_v6 = vld [vmem:[%s2362_s5 + $0x120] ss:$12 sps:$4 sm:$0xff]   ;;  %vm1823_vm1 = vmmov 0  }
  0x45   :  { %v1754_v8 = vld [vmem:[%s2362_s5 + $0x13c] ss:$12 sps:$4 sm:$0xff]   ;;  %v2093_v9 = vld [vmem:[%s2359_s2] sm:$0xf]  ;;  %v1752_v11 = vld [vmem:[%s2362_s5 + $0x138] ss:$12 sps:$4 sm:$0xff]  }
  0x46   :  { %1023 = vmatpush1.bf16.msra.mxu1 %v1719_v48  ;;  %v2085_v7 = vsub.s32 0, %v2076_v4  ;;  %v2096_v10 = vsub.s32 1, %v2076_v4  ;;  %v59_v19 = vsub.s32 3, %v2076_v4  ;;  %v1665_v24 = vld [vmem:[%s2360_s3 + $0x100] ss:$8 sps:$4 sm:$0xff]   ;;  %vm1272_vm2 = vcmask 523264  }
  0x47   :  { %1024 = vmatprep.subr.bf16.mxu1 %v1724_v49  ;;  %v1670_v27 = vld [vmem:[%s2360_s3 + $0x114] ss:$8 sps:$4 sm:$0xff]   ;;  %v1668_v30 = vld [vmem:[%s2360_s3 + $0x110] ss:$8 sps:$4 sm:$0xff]   ;;  %v1673_v33 = vld [vmem:[%s2360_s3 + $0x124] ss:$8 sps:$4 sm:$0xff]  }
  0x48   :  { %v48_v12 = vrot.slane %v2093_v9, %v2085_v7  ;;  %v52_v13 = vrot.slane %v2093_v9, %v2096_v10  ;;  %v60_v25 = vrot.slane %v2093_v9, %v59_v19  ;;  %v1671_v36 = vld [vmem:[%s2360_s3 + $0x120] ss:$8 sps:$4 sm:$0xff]   ;;  %v1676_v38 = vld [vmem:[%s2360_s3 + $0x134] ss:$8 sps:$4 sm:$0xff]   ;;  %v1674_v39 = vld [vmem:[%s2360_s3 + $0x130] ss:$8 sps:$4 sm:$0xff]  }
  0x49   :  { %v1679_v40 = vld [vmem:[%s2360_s3 + $0x144] ss:$8 sps:$4 sm:$0xff]   ;;  %v1677_v41 = vld [vmem:[%s2360_s3 + $0x140] ss:$8 sps:$4 sm:$0xff]   ;;  %v1682_v42 = vld [vmem:[%s2360_s3 + $0x154] ss:$8 sps:$4 sm:$0xff]  }
  0x4a   :  { %1025 = vmatpush1.bf16.msra.mxu1 %v1722_v50  ;;  %v1680_v43 = vld [vmem:[%s2360_s3 + $0x150] ss:$8 sps:$4 sm:$0xff]   ;;  %v1685_v44 = vld [vmem:[%s2360_s3 + $0x164] ss:$8 sps:$4 sm:$0xff]   ;;  %v1683_v45 = vld [vmem:[%s2360_s3 + $0x160] ss:$8 sps:$4 sm:$0xff]  }
  0x4b   :  { %1026 = vmatprep.subr.bf16.mxu1 %v1727_v51  ;;  %v1688_v46 = vld [vmem:[%s2360_s3 + $0x174] ss:$8 sps:$4 sm:$0xff]   ;;  %v1686_v47 = vld [vmem:[%s2360_s3 + $0x170] ss:$8 sps:$4 sm:$0xff]   ;;  %v1691_v48 = vld [vmem:[%s2360_s3 + $0x184] ss:$8 sps:$4 sm:$0xff]  }
  0x4c   :  { %v1689_v49 = vld [vmem:[%s2360_s3 + $0x180] ss:$8 sps:$4 sm:$0xff]   ;;  %v1694_v50 = vld [vmem:[%s2360_s3 + $0x194] ss:$8 sps:$4 sm:$0xff]   ;;  %v1692_v51 = vld [vmem:[%s2360_s3 + $0x190] ss:$8 sps:$4 sm:$0xff]  }
  0x4d   :  { %vm1365_vm4 = vcmask 72704   ;;  %s1824_s29 = smov [#allocation2]  }
  0x4e   :  { %1027 = vmatpush1.bf16.msra.mxu1 %v1725_v52  ;;  %v1697_v52 = vld [vmem:[%s2360_s3 + $0x1a4] ss:$8 sps:$4 sm:$0xff]  }
  0x4f   :  { %1028 = vmatprep.subr.bf16.mxu1 %v1730_v53  ;;  %v1695_v53 = vld [vmem:[%s2360_s3 + $0x1a0] ss:$8 sps:$4 sm:$0xff]  }
  0x52   :  { %1029 = vmatpush1.bf16.msra.mxu1 %v1728_v54  ;;  %v1700_v54 = vld [vmem:[%s2360_s3 + $0x1b4] ss:$8 sps:$4 sm:$0xff]  }
  0x53   :  { %1030 = vmatprep.subr.bf16.mxu1 %v1733_v55  ;;  %v1698_v55 = vld [vmem:[%s2360_s3 + $0x1b0] ss:$8 sps:$4 sm:$0xff]  }
  0x56   :  { %1031 = vmatpush1.bf16.msra.mxu1 %v1731_v56  ;;  %v1703_v56 = vld [vmem:[%s2360_s3 + $0x1c4] ss:$8 sps:$4 sm:$0xff]  }
  0x57   :  { %1032 = vmatprep.subr.bf16.mxu1 %v1736_v57  ;;  %v1701_v57 = vld [vmem:[%s2360_s3 + $0x1c0] ss:$8 sps:$4 sm:$0xff]  }
  0x5a   :  { %1033 = vmatpush1.bf16.msra.mxu1 %v1734_v58  ;;  %v55_v58 = vsub.s32 2, %v2076_v4  ;;  %v1511_v4 = vld [vmem:[%s2365_s8] ss:$0 sm:$0xff]  ;;  %s1381_s8 = sshll.u32 %s1824_s29, 4  ;;  %s1382_s8 = int_to_ptr.vmem [resolvable:$true] %s1381_s8 }
  0x5b   :  { %1034 = vmatprep.subr.bf16.mxu1 %v1739_v59  ;;  %v1706_v59 = vld [vmem:[%s2360_s3 + $0x1d4] ss:$8 sps:$4 sm:$0xff]   ;;  %s1797_s30 = scalar_lea.vmem %s1382_s8, 128  ;;  %p1802_p1 = scmp.lt.s32.totalorder %s1382_s8, %s1382_s8 }
  0x5c   :  { %p1798_p0 = scmp.ne.s32.totalorder %s1382_s8, %s1797_s30  ;;  %p1803_p2 = scmp.lt.s32.totalorder %s1797_s30, %s1797_s30 }
  0x5e   :  { %1035 = vmatpush1.bf16.msra.mxu1 %v1737_v60  ;;  %v1704_v60 = vld [vmem:[%s2360_s3 + $0x1d0] ss:$8 sps:$4 sm:$0xff]   ;;  %p1804_p3 = por %p1803_p2, %p1802_p1 }
  0x5f   :  { %1036 = vmatprep.subr.bf16.mxu1 %v1742_v61  ;;  %v56_v61 = vrot.slane %v2093_v9, %v55_v58  ;;  %v1755_v9 = vld [vmem:[%s2362_s5 + $0x150] ss:$12 sps:$4 sm:$0xff]  }
  0x60   :  { %p1805_p4 = pnand %p1804_p3, %p1798_p0 }
  0x62   :  { %1037 = vmatpush1.bf16.msra.mxu1 %v1740_v62  ;;  %v1709_v62 = vld [vmem:[%s2360_s3 + $0x1e4] ss:$8 sps:$4 sm:$0xff]  }
  0x63   :  { %1038 = vmatprep.subr.bf16.mxu1 %v1745_v63  ;;  %v1707_v63 = vld [vmem:[%s2360_s3 + $0x1e0] ss:$8 sps:$4 sm:$0xff]  }
  0x66   :  { %1039 = vmatpush1.bf16.msra.mxu1 %v1743_v0 }
  0x67   :  { %1040 = vmatprep.subr.bf16.mxu1 %v1748_v2  ;;  %v1712_v2 = vld [vmem:[%s2360_s3 + $0x1f4] ss:$8 sps:$4 sm:$0xff]  }
  0x6a   :  { %1041 = vmatpush1.bf16.msra.mxu1 %v1746_v3  ;;  %v1710_v3 = vld [vmem:[%s2360_s3 + $0x1f0] ss:$8 sps:$4 sm:$0xff]  }
  0x6b   :  { %1042 = vmatprep.subr.bf16.mxu1 %v1751_v5 }
  0x6e   :  { %1043 = vmatpush1.bf16.msra.mxu1 %v1749_v6 }
  0x6f   :  { %1044 = vmatprep.subr.bf16.mxu1 %v1754_v8  ;;  %v1757_v8 = vld [vmem:[%s2362_s5 + $0x154] ss:$12 sps:$4 sm:$0xff]  }
  0x72   :  { %1045 = vmatpush1.bf16.msra.mxu1 %v1752_v11  ;;  %v1760_v11 = vld [vmem:[%s2362_s5 + $0x16c] ss:$12 sps:$4 sm:$0xff]  }
  0x73   :  { %1046 = vmatprep.subr.bf16.mxu1 %v1757_v8 }
  0x76   :  { %1047 = vmatpush1.bf16.msra.mxu1 %v1755_v9 }
  0x77   :  { %1048 = vmatprep.subr.bf16.mxu1 %v1760_v11 }
  0xdd   :  { %v143_v14 = vpop.f32.mrb[0].mxu1 }
  0xde   :  { %v144_v15 = vadd.f32 %v143_v14, %v48_v12  ;;  %v145_v16 = vpop.f32.mrb[1].mxu1  ;;  %v1758_v12 = vld [vmem:[%s2362_s5 + $0x168] ss:$12 sps:$4 sm:$0xff]   ;;  %v263_v14 = vld [vmem:[%s2361_s4] sm:$0x3] }
  0xdf   :  { %v146_v17 = vadd.f32 %v145_v16, %v52_v13  ;;  %v147_v18 = vpop.f32.mrb[2].mxu1  ;;  %1049 = vmatpush1.bf16.msra.mxu1 %v1758_v12  ;;  %v1761_v13 = vld [vmem:[%s2362_s5 + $0xc8] ss:$12 sps:$4 sm:$0xff]   ;;  %v272_v16 = vrot.slane %v263_v14, %v2096_v10 }
  0xe0   :  { %v191_v20 = vmax.f32 %v144_v15, 0.0  ;;  %v148_v21 = vpop.f32.mrb[3].mxu1  ;;  %1534 = vmatprep.subr.bf16.mxu1 %v1761_v13  ;;  %v268_v15 = vrot.slane %v263_v14, %v2085_v7 }
  0xe1   :  { %v192_v22 = vmax.f32 %v146_v17, 0.0 }
  0xe2   :  { %v195_v26 = vpack.c.bf16 %v191_v20, %v191_v20 }
  0xe3   :  { %v196_v23 = vpack.c.bf16 %v192_v22, %v192_v22 }
  0xe5   :  { %627 = vmatprep.mubr.bf16.mxu0 %v196_v23  ;;  %v2113_v28 = vpop.f32.mrb[4].mxu1 }
  0xe6   :  { %628 = vmatmul.mubr.bf16.vlgmr.msra.gmra.mrb[0].mxu0 %v195_v26  ;;  %v186_v29 = vpop.f32.mrb[5].mxu1  ;;  %v185_v0 = vadd.f32 %v2113_v28, %v56_v61  ;;  %v1762_v26 = vld [vmem:[%s2362_s5 + $0x8] ss:$12 sps:$4 sm:$0xff]   ;;  %v1763_v28 = vld [vmem:[%s2362_s5 + $0xe0] ss:$12 sps:$4 sm:$0xff]  }
  0xe7   :  { %637 = vmatpush1.bf16.msra.mxu0 %v1665_v24  ;;  %v187_v31 = vadd.f32 %v186_v29, %v60_v25  ;;  %v188_v32 = vpop.f32.mrb[6].mxu1  ;;  %v1764_v29 = vld [vmem:[%s2362_s5 + $0x20] ss:$12 sps:$4 sm:$0xff]  }
  0xe8   :  { %638 = vmatprep.subr.bf16.mxu0 %v1670_v27  ;;  %v189_v34 = vpop.f32.mrb[7].mxu1  ;;  %v193_v5 = vmax.f32 %v185_v0, 0.0  ;;  %v1767_v32 = vld [vmem:[%s2362_s5 + $0x110] ss:$12 sps:$4 sm:$0xff]   ;;  %v1794_v61 = vld [vmem:[%s2364_s7 + $0x88] sm:$0xff]  }
  0xe9   :  { %v194_v35 = vmax.f32 %v187_v31, 0.0  ;;  %v1766_v31 = vld [vmem:[%s2362_s5 + $0x38] ss:$12 sps:$4 sm:$0xff]   ;;  %v1769_v34 = vld [vmem:[%s2362_s5 + $0x128] ss:$12 sps:$4 sm:$0xff]  }
  0xea   :  { %v197_v6 = vpack.c.bf16 %v193_v5, %v193_v5  ;;  %v745_v0 = vld [vmem:[%s2363_s6] sm:$0x7] }
  0xeb   :  { %639 = vmatpush1.bf16.msra.mxu0 %v1668_v30  ;;  %v198_v37 = vpack.c.bf16 %v194_v35, %v194_v35  ;;  %v1765_v30 = vld [vmem:[%s2362_s5 + $0xf8] ss:$12 sps:$4 sm:$0xff]   ;;  %v1770_v35 = vld [vmem:[%s2362_s5 + $0x68] ss:$12 sps:$4 sm:$0xff]  }
  0xec   :  { %640 = vmatprep.subr.bf16.mxu0 %v1673_v33  ;;  %v1768_v33 = vld [vmem:[%s2362_s5 + $0x50] ss:$12 sps:$4 sm:$0xff]  }
  0xed   :  { %668 = vmatprep.mubr.bf16.mxu0 %v198_v37  ;;  %v1772_v37 = vld [vmem:[%s2362_s5 + $0x80] ss:$12 sps:$4 sm:$0xff]  }
  0xef   :  { %641 = vmatpush1.bf16.msra.mxu0 %v1671_v36  ;;  %v1771_v36 = vld [vmem:[%s2362_s5 + $0x140] ss:$12 sps:$4 sm:$0xff]  }
  0xf0   :  { %642 = vmatprep.subr.bf16.mxu0 %v1676_v38  ;;  %v1773_v38 = vld [vmem:[%s2362_s5 + $0x158] ss:$12 sps:$4 sm:$0xff]  }
  0xf3   :  { %643 = vmatpush1.bf16.msra.mxu0 %v1674_v39  ;;  %v1774_v39 = vld [vmem:[%s2362_s5 + $0x98] ss:$12 sps:$4 sm:$0xff]  }
  0xf4   :  { %644 = vmatprep.subr.bf16.mxu0 %v1679_v40  ;;  %v1775_v40 = vld [vmem:[%s2362_s5 + $0x170] ss:$12 sps:$4 sm:$0xff]  }
  0xf7   :  { %645 = vmatpush1.bf16.msra.mxu0 %v1677_v41  ;;  %v1776_v41 = vld [vmem:[%s2362_s5 + $0xb0] ss:$12 sps:$4 sm:$0xff]  }
  0xf8   :  { %646 = vmatprep.subr.bf16.mxu0 %v1682_v42  ;;  %v1777_v42 = vld [vmem:[%s2364_s7 + $0x40] sm:$0xff]  }
  0xfb   :  { %647 = vmatpush1.bf16.msra.mxu0 %v1680_v43  ;;  %v1778_v43 = vld [vmem:[%s2364_s7] sm:$0xff]  }
  0xfc   :  { %648 = vmatprep.subr.bf16.mxu0 %v1685_v44  ;;  %v1779_v44 = vld [vmem:[%s2364_s7 + $0x48] sm:$0xff]  }
  0xff   :  { %649 = vmatpush1.bf16.msra.mxu0 %v1683_v45  ;;  %v1780_v45 = vld [vmem:[%s2364_s7 + $0x8] sm:$0xff]  }
 0x100   :  { %650 = vmatprep.subr.bf16.mxu0 %v1688_v46  ;;  %v1781_v46 = vld [vmem:[%s2364_s7 + $0x50] sm:$0xff]  }
 0x103   :  { %651 = vmatpush1.bf16.msra.mxu0 %v1686_v47  ;;  %v1782_v47 = vld [vmem:[%s2364_s7 + $0x10] sm:$0xff]  }
 0x104   :  { %652 = vmatprep.subr.bf16.mxu0 %v1691_v48  ;;  %v1783_v48 = vld [vmem:[%s2364_s7 + $0x58] sm:$0xff]  }
 0x107   :  { %653 = vmatpush1.bf16.msra.mxu0 %v1689_v49  ;;  %v1784_v49 = vld [vmem:[%s2364_s7 + $0x18] sm:$0xff]  }
 0x108   :  { %654 = vmatprep.subr.bf16.mxu0 %v1694_v50  ;;  %v1785_v50 = vld [vmem:[%s2364_s7 + $0x60] sm:$0xff]  }
 0x10b   :  { %655 = vmatpush1.bf16.msra.mxu0 %v1692_v51  ;;  %v1786_v51 = vld [vmem:[%s2364_s7 + $0x20] sm:$0xff]  }
 0x10c   :  { %656 = vmatprep.subr.bf16.mxu0 %v1697_v52  ;;  %v1787_v52 = vld [vmem:[%s2364_s7 + $0x68] sm:$0xff]  }
 0x10f   :  { %657 = vmatpush1.bf16.msra.mxu0 %v1695_v53  ;;  %v1788_v53 = vld [vmem:[%s2364_s7 + $0x28] sm:$0xff]  }
 0x110   :  { %658 = vmatprep.subr.bf16.mxu0 %v1700_v54  ;;  %v1789_v54 = vld [vmem:[%s2364_s7 + $0x70] sm:$0xff]  }
 0x113   :  { %659 = vmatpush1.bf16.msra.mxu0 %v1698_v55  ;;  %v1790_v55 = vld [vmem:[%s2364_s7 + $0x30] sm:$0xff]  }
 0x114   :  { %660 = vmatprep.subr.bf16.mxu0 %v1703_v56  ;;  %v1791_v56 = vld [vmem:[%s2364_s7 + $0x78] sm:$0xff]  }
 0x117   :  { %661 = vmatpush1.bf16.msra.mxu0 %v1701_v57  ;;  %v1792_v57 = vld [vmem:[%s2364_s7 + $0x38] sm:$0xff]  }
 0x118   :  { %662 = vmatprep.subr.bf16.mxu0 %v1706_v59  ;;  %v1793_v59 = vld [vmem:[%s2364_s7 + $0x80] sm:$0xff]  }
 0x11b   :  { %663 = vmatpush1.bf16.msra.mxu0 %v1704_v60  ;;  %v1822_v60 = vmov 0.0  }
 0x11c   :  { %664 = vmatprep.subr.bf16.mxu0 %v1709_v62  ;;  %v1795_v62 = vld [vmem:[%s2364_s7 + $0x90] sm:$0xff]  }
 0x11f   :  { %665 = vmatpush1.bf16.msra.mxu0 %v1707_v63  ;;  %v1796_v63 = vld [vmem:[%s2364_s7 + $0x98] sm:$0xff]  }
 0x120   :  { %666 = vmatprep.subr.bf16.mxu0 %v1712_v2  ;;  %v750_v2 = vrot.slane %v745_v0, %v2085_v7 }
 0x123   :  { %667 = vmatpush1.bf16.msra.mxu0 %v1710_v3  ;;  %v754_v3 = vrot.slane %v745_v0, %v2096_v10 }
 0x124   :  { %1583 = vmatprep.subr.bf16.mxu0 %v1822_v60 }
 0x126   :  { %669 = vmatmul.mubr.bf16.vlgmr.msra.gmra.mrb[0].mxu0 %v197_v6 }
 0x127   :  { %1584 = vmatpush3.bf16.msra.mxu0 %v1793_v59  ;;  %1591 = vmatprep.mubr.msk.bf16.mxu0 %vm1823_vm1, %v1822_v60 }
 0x128   :  { %1585 = vmatprep.subr.bf16.mxu0 %v1822_v60 }
 0x12b   :  { %1586 = vmatpush3.bf16.msra.mxu0 %v1794_v61 }
 0x12c   :  { %1587 = vmatprep.subr.bf16.mxu0 %v1822_v60 }
 0x12f   :  { %1588 = vmatpush3.bf16.msra.mxu0 %v1795_v62 }
 0x130   :  { %1589 = vmatprep.subr.bf16.mxu0 %v1822_v60 }
 0x133   :  { %1590 = vmatpush3.bf16.msra.mxu0 %v1796_v63 }
 0x1f9   :  { %v670_v17 = vpop.f32.mrb[0].mxu0 }
 0x1fa   :  { %v1595_v18 = vadd.f32 %v670_v17, %v268_v15  ;;  %v672_v19 = vpop.f32.mrb[1].mxu0 }
 0x1fb   :  { %v1596_v20 = vadd.f32 %v672_v19, %v272_v16  ;;  %v674_v21 = vpop.f32.mrb[2].mxu0 }
 0x1fc   :  { %v677_v22 = vmax.f32 %v1595_v18, 0.0  ;;  %v675_v23 = vpop.f32.mrb[3].mxu0  ;;  %v758_v18 = vrot.slane %v745_v0, %v55_v58 }
 0x1fd   :  { %v678_v24 = vmax.f32 %v1596_v20, 0.0 }
 0x1fe   :  { %v679_v27 = vpack.c.bf16 %v677_v22, %v677_v22 }
 0x1ff   :  { %v680_v25 = vpack.c.bf16 %v678_v24, %v678_v24 }
 0x201   :  { %1050 = vmatprep.mubr.bf16.mxu1 %v680_v25 }
 0x202   :  { %1051 = vmatmul.mubr.bf16.vlgmr.msra.gmra.mrb[8].mxu1 %v679_v27 }
 0x203   :  { %1535 = vmatpush3.bf16.msra.mxu1 %v1762_v26  ;;  %1091 = vmatprep.mubr.bf16.mxu1 %v680_v25 }
 0x204   :  { %1536 = vmatprep.subr.bf16.mxu1 %v1763_v28 }
 0x207   :  { %1537 = vmatpush3.bf16.msra.mxu1 %v1764_v29  ;;  %v1358_v29 = vand.u32 127, %v45_v1 }
 0x208   :  { %1538 = vmatprep.subr.bf16.mxu1 %v1765_v30 }
 0x209   :  { %vm1359_vm3 = vcmp.lt.s32.totalorder %v1358_v29, 8 }
 0x20a   :  { %v1533_v58 = vsel %vm1359_vm3, 1.0, %v1822_v60 }
 0x20b   :  { %1539 = vmatpush3.bf16.msra.mxu1 %v1766_v31 }
 0x20c   :  { %1540 = vmatprep.subr.bf16.mxu1 %v1767_v32 }
 0x20f   :  { %1541 = vmatpush3.bf16.msra.mxu1 %v1768_v33 }
 0x210   :  { %1542 = vmatprep.subr.bf16.mxu1 %v1769_v34  ;;  %v1363_v34 = vsub.f32 1.0, %v1533_v58 }
 0x213   :  { %1543 = vmatpush3.bf16.msra.mxu1 %v1770_v35 }
 0x214   :  { %1544 = vmatprep.subr.bf16.mxu1 %v1771_v36 }
 0x217   :  { %1545 = vmatpush3.bf16.msra.mxu1 %v1772_v37 }
 0x218   :  { %1546 = vmatprep.subr.bf16.mxu1 %v1773_v38 }
 0x21b   :  { %1547 = vmatpush3.bf16.msra.mxu1 %v1774_v39 }
 0x21c   :  { %1548 = vmatprep.subr.bf16.mxu1 %v1775_v40 }
 0x21f   :  { %1549 = vmatpush3.bf16.msra.mxu1 %v1776_v41 }
 0x220   :  { %1556 = vmatprep.subr.bf16.mxu1 %v1777_v42 }
 0x222   :  { %1092 = vmatmul.mubr.bf16.vlgmr.msra.gmra.mrb[12].mxu1 %v679_v27 }
 0x223   :  { %1557 = vmatpush3.bf16.msra.mxu1 %v1778_v43 }
 0x224   :  { %1558 = vmatprep.subr.bf16.mxu1 %v1779_v44 }
 0x227   :  { %1559 = vmatpush3.bf16.msra.mxu1 %v1780_v45 }
 0x228   :  { %1560 = vmatprep.subr.bf16.mxu1 %v1781_v46 }
 0x22b   :  { %1561 = vmatpush3.bf16.msra.mxu1 %v1782_v47 }
 0x22c   :  { %1562 = vmatprep.subr.bf16.mxu1 %v1783_v48 }
 0x22f   :  { %1563 = vmatpush3.bf16.msra.mxu1 %v1784_v49 }
 0x230   :  { %1564 = vmatprep.subr.bf16.mxu1 %v1785_v50 }
 0x233   :  { %1565 = vmatpush3.bf16.msra.mxu1 %v1786_v51 }
 0x234   :  { %1566 = vmatprep.subr.bf16.mxu1 %v1787_v52 }
 0x237   :  { %1567 = vmatpush3.bf16.msra.mxu1 %v1788_v53 }
 0x238   :  { %1568 = vmatprep.subr.bf16.mxu1 %v1789_v54 }
 0x23b   :  { %1569 = vmatpush3.bf16.msra.mxu1 %v1790_v55 }
 0x23c   :  { %1570 = vmatprep.subr.bf16.mxu1 %v1791_v56 }
 0x23f   :  { %1571 = vmatpush3.bf16.msra.mxu1 %v1792_v57 }
 0x2d5   :  { %v1052_v5 = vpop.f32.mrb[8].mxu1 }
 0x2d6   :  { %v1053_v6 = vadd.f32 %v1052_v5, %v750_v2  ;;  %v1054_v8 = vpop.f32.mrb[9].mxu1 }
 0x2d7   :  { %v1055_v9 = vadd.f32 %v1054_v8, %v754_v3  ;;  %v1056_v11 = vpop.f32.mrb[10].mxu1 }
 0x2d8   :  { %v1099_v12 = vmax.f32 %v1053_v6, 0.0  ;;  %v1057_v13 = vpop.f32.mrb[11].mxu1 }
 0x2d9   :  { %v1100_v14 = vmax.f32 %v1055_v9, 0.0 }
 0x2da   :  { %v1102_v16 = vpack.c.bf16 %v1099_v12, %v1099_v12 }
 0x2db   :  { %v1103_v15 = vpack.c.bf16 %v1100_v14, %v1100_v14 }
 0x2dd   :  { %1308 = vmatprep.mubr.bf16.mxu1 %v1103_v15 }
 0x2de   :  { %1309 = vmatmul.mubr.bf16.vlgmr.msra.gmra.mrb[16].mxu1 %v1102_v16 }
 0x2f5   :  { %v1550_v17 = vpop.f32.mrb[12].mxu1 }
 0x2f6   :  { %v1551_v19 = vpop.f32.mrb[13].mxu1 }
 0x2f7   :  { %v1552_v7 = vadd.f32 %v1551_v19, %v1550_v17  ;;  %v1553_v20 = vpop.f32.mrb[14].mxu1 }
 0x2f8   :  { %v1554_v10 = vpop.f32.mrb[15].mxu1 }
 0x2f9   :  { %v1094_v21 = vadd.f32 %v1552_v7, %v758_v18 }
 0x2fb   :  { %v1101_v22 = vmax.f32 %v1094_v21, 0.0 }
 0x2fd   :  { %v1104_v23 = vpack.c.bf16 %v1101_v22, %v1101_v22 }
 0x2ff   :  { %1592 = vmatmul.mubr.msk.bf16.vlgmr.msra.gmra.mrb[4].mxu0 %vm1272_vm2, %v1104_v23 }
 0x3b1   :  { %v1572_v24 = vpop.f32.mrb[16].mxu1 }
 0x3b2   :  { %v1573_v25 = vpop.f32.mrb[17].mxu1 }
 0x3b3   :  { %v1574_v26 = vadd.f32 %v1573_v25, %v1572_v24  ;;  %v1575_v27 = vpop.f32.mrb[18].mxu1 }
 0x3b4   :  { %v1576_v28 = vpop.f32.mrb[19].mxu1 }
 0x3b5   :  { %v1311_v30 = vadd.f32 %v1574_v26, %v1511_v4 }
 0x3d2   :  { %v1350_v31 = vpop.f32.mrb[4].mxu0 }
 0x3d3   :  { %v1351_v32 = vadd.f32 %v1350_v31, %v1311_v30  ;;  %v1593_v33 = vpop.f32.mrb[5].mxu0 }
 0x3d4   :  { %v1353_v35 = vpop.f32.mrb[6].mxu0 }
 0x3d5   :  { %v1356_v36 = vmax.f32 %v1351_v32, 0.0  ;;  %v1594_v37 = vpop.f32.mrb[7].mxu0 }
 0x3d7   :  { %v1364_v38 = vmul.f32 %v1363_v34, %v1356_v36  ;;  %v1362_v40 = vmul.f32 %v1533_v58, %v1356_v36 }
 0x3d9   :  { %v1366_v39 = vsel %vm1365_vm4, %v1364_v38, 0.0  ;;  %v1369_v1 = vsel %vm1365_vm4, %v1362_v40, 0.0 }
 0x3da   :  { %1367 = vadd.xlane.f32.xlu0 %v1366_v39 }
 0x3de   :  { %1370 = vadd.xlane.f32.xlu0 %v1369_v1 }
 0x467   :  { %v1368_v41 = vpop.xlane.xlu0 %1367 }
 0x468   :  { %v1372_v42 = vadd.f32 %v1368_v41, %v1362_v40 }
 0x46b   :  { %v1371_v43 = vpop.xlane.xlu0 %1370 }
 0x46c   :  { %v1373_v44 = vsel %vm1359_vm3, %v1372_v42, %v1371_v43 }
 0x46d   :  { %1374 = vst.msk [vmem:[#allocation2] sm:$0xff] %vm1365_vm4, %v1373_v44 }
 0x46e   :  { %1808 = shalt.err (!%p1805_p4)
}
 0x46f   :  { %s1809_s11 = scalar_lea.hbm %s2366_s9, 128 }
 0x470   :  { %p1810_p5 = scmp.ne.s32.totalorder %s2366_s9, %s1809_s11  ;;  %p1813_p6 = scmp.lt.u32.totalorder %s1809_s11, %s2366_s9 }
 0x472   :  { %p1815_p7 = pnand %p1813_p6, %p1810_p5 }
 0x474   :  { %1818 = shalt.err (!%p1815_p7)
}
 0x475   :  { %1384 = dma.vmem_to_hbm [thread:$0]  %s1382_s8, 128, %s2366_s9, [#allocation3]  }
 0x476   :  { %1819 = dma.done.wait [#allocation3], 128  }
 0x477   :  { %1820 = vsyncadd [#allocation3], 4294967168 }
 0x478   :  { %1388 = vsyncpa [#allocation3], 1 }

</bundles_post_ra>
